<compile_context>
chip_gen: v7x
topology: tpu7x:2x2x1
jax: 0.10.0
libtpu: 0.0.40
codegen_flags: <defaults>
</compile_context>

<pallas_src>
import functools

import jax
import jax.numpy as jnp
from jax.experimental import pallas as pl
from jax.experimental.pallas import tpu as pltpu


def _round_up(x, m):
    return (x + m - 1) // m * m


def _divloss_kernel(q_ref, ft_ref, tgt_ref, tgtp_ref, loss_ref,
                    qn_ref, pp_ref, colsum_ref, acc_ref,
                    *, B, C, TB, nbt):
    p = pl.program_id(0)          # phase: 0 = stream batch tiles, 1 = NLL epilogue
    i = pl.program_id(1)          # batch tile index

    nn_scale = float(min(10, B)) / float(B)

    @pl.when((p == 0) & (i == 0))
    def _init():
        q = q_ref[...]                                            # (C, D) f32
        qn_ref[...] = q * jax.lax.rsqrt(
            jnp.maximum(jnp.sum(q * q, axis=1, keepdims=True), 1e-24))
        colsum_ref[...] = jnp.zeros_like(colsum_ref)
        acc_ref[...] = jnp.zeros_like(acc_ref)

    off = pl.multiple_of(i * TB, TB)

    @pl.when(p == 0)
    def _phase0():
        ft = ft_ref[...]                                          # (D, TB) f32
        # F.normalize(p=2, dim=1) over D == sublane axis -> cheap sublane reduce.
        f_n = ft * jax.lax.rsqrt(
            jnp.maximum(jnp.sum(ft * ft, axis=0, keepdims=True), 1e-24))
        # (C, D) @ (D, TB) -> (C, TB), natural (M,K)x(K,N), f32 accumulate on MXU.
        pt = jax.lax.dot_general(qn_ref[...], f_n, (((1,), (0,)), ((), ())),
                                 preferred_element_type=jnp.float32)
        cls = jax.lax.broadcasted_iota(jnp.int32, (C, TB), 0)
        # P[b, target[b]]: compare + select + sublane sum (no materialized one-hot).
        pos = jnp.sum(jnp.where(cls == tgt_ref[...], pt, 0.0),
                      axis=0, keepdims=True)                      # (1, TB)
        pp_ref[:, pl.ds(off, TB)] = pos
        # Global column sums of P (padded lanes contribute exact zeros).
        colsum_ref[...] += jnp.sum(pt, axis=1, keepdims=True)     # (C, 1)

    @pl.when(p == 1)
    def _phase1():
        cls = jax.lax.broadcasted_iota(jnp.int32, (C, TB), 0)
        cs = jnp.broadcast_to(colsum_ref[...], (C, TB))
        # pred_nn pairing: colsum(P)[target[inv_order[b]]], scaled by min(10,B)/B.
        pnn = nn_scale * jnp.sum(jnp.where(cls == tgtp_ref[...], cs, 0.0),
                                 axis=0, keepdims=True)           # (1, TB)
        sa = 100.0 * pp_ref[:, pl.ds(off, TB)]
        sb = 100.0 * pnn
        mx = jnp.maximum(sa, sb)
        lse = mx + jnp.log(jnp.exp(sa - mx) + jnp.exp(sb - mx))
        valid = tgt_ref[...] >= 0                                 # padded lanes -> False
        acc_ref[...] += jnp.sum(jnp.where(valid, lse - sa, 0.0),
                                axis=1, keepdims=True)            # (1, 1)

        @pl.when(i == nbt - 1)
        def _final():
            loss_ref[...] = acc_ref[...] * (1.0 / float(B))


@jax.jit
def div_loss(feature, query, target):
    """Pallas implementation of DIVLoss.forward(feature, query, target) -> scalar."""
    B, D = feature.shape
    C = query.shape[0]
    feature = feature.astype(jnp.float32)
    query = query.astype(jnp.float32)
    target = target.astype(jnp.int32)

    # TODO(synk): the class-major pairing of torch.masked_select needs a stable argsort
    # of `target`; a data-dependent sort has no clean Pallas/TPU equivalent, so this
    # length-B sort stays in XLA (fused into the same jitted program as the kernel).
    order = jnp.argsort(target, stable=True)
    inv_order = jnp.argsort(order)
    tgt_perm = target[inv_order]

    # Pad batch to a lane multiple; tile 256 for v6e/v7x MXU shape when possible,
    # 128 otherwise (v5e / small batches).
    Bpad = _round_up(max(B, 128), 128)
    TB = 256 if (Bpad % 256 == 0 and Bpad >= 256) else 128
    nbt = Bpad // TB

    # Pre-transposed (D, Bpad) feature so the matmul RHS is already (K, N) lane-dense.
    ft = jnp.pad(feature.T, ((0, 0), (0, Bpad - B)))
    tgt_row = jnp.pad(target, (0, Bpad - B), constant_values=-1).reshape(1, Bpad)
    tgtp_row = jnp.pad(tgt_perm, (0, Bpad - B), constant_values=-1).reshape(1, Bpad)

    kernel = functools.partial(_divloss_kernel, B=B, C=C, TB=TB, nbt=nbt)

    # Phase 1 never touches feature; keep the last tile resident so no refetch occurs.
    ft_index = lambda p, i: (0, i * (1 - p) + (nbt - 1) * p)

    grid_spec = pltpu.PrefetchScalarGridSpec(
        num_scalar_prefetch=0,
        grid=(2, nbt),
        in_specs=[
            pl.BlockSpec((C, D), lambda p, i: (0, 0)),      # query (resident)
            pl.BlockSpec((D, TB), ft_index),                # feature tile (pipelined)
            pl.BlockSpec((1, TB), lambda p, i: (0, i)),     # target tile
            pl.BlockSpec((1, TB), lambda p, i: (0, i)),     # target[inv_order] tile
        ],
        out_specs=pl.BlockSpec((1, 1), lambda p, i: (0, 0)),
        scratch_shapes=[
            pltpu.VMEM((C, D), jnp.float32),     # normalized query (computed once)
            pltpu.VMEM((1, Bpad), jnp.float32),  # per-row P[b, target[b]]
            pltpu.VMEM((C, 1), jnp.float32),     # colsum(P)
            pltpu.VMEM((1, 1), jnp.float32),     # loss accumulator
        ],
    )

    # VMEM budget from the actual working set (portable across v5e/v6e/v7x),
    # double-buffered inputs included, with margin.
    itemsz = 4
    need = (2 * C * D * itemsz            # query, 2 buffers
            + 2 * D * TB * itemsz         # feature tile, 2 buffers
            + 2 * 2 * TB * itemsz         # target / perm tiles, 2 buffers each
            + C * D * itemsz              # q_n scratch
            + Bpad * itemsz + C * itemsz + 16)
    vmem_limit = int(min(max(2 * need + (4 << 20), 16 << 20), 100 << 20))

    cost = pl.CostEstimate(
        flops=int(2 * C * D * Bpad + 8 * C * Bpad + 16 * Bpad),
        transcendentals=int(C + 4 * Bpad),
        bytes_accessed=int(itemsz * (C * D + D * Bpad + 2 * Bpad + 1)))

    out = pl.pallas_call(
        kernel,
        out_shape=jax.ShapeDtypeStruct((1, 1), jnp.float32),
        grid_spec=grid_spec,
        compiler_params=pltpu.CompilerParams(
            dimension_semantics=("arbitrary", "arbitrary"),
            vmem_limit_bytes=vmem_limit),
        cost_estimate=cost,
    )(query, ft, tgt_row, tgtp_row)
    return out[0, 0]


def div_loss_ref(feature, query, target):
    """Pure-jnp reference mirroring the PyTorch DIVLoss.forward path exactly (f32)."""
    fn = feature / jnp.maximum(jnp.linalg.norm(feature, axis=1, keepdims=True), 1e-12)
    qn = query / jnp.maximum(jnp.linalg.norm(query, axis=1, keepdims=True), 1e-12)
    P = fn @ qn.T                                                    # (B, C)
    order = jnp.argsort(target, stable=True)                        # masked_select order
    pred = P[order, target[order]][:, None]                         # (B, 1)
    label_matrix = target[:, None] == target[None, :]
    S = (fn @ fn.T) * (~label_matrix).astype(fn.dtype)
    nn_label = (jnp.argsort(-S, axis=-1) < 10).astype(fn.dtype)      # (B, B)
    pred_nn_mat = jnp.take(P, target, axis=1).T                      # [i, j] = P[j, target[i]]
    pred_nn = jnp.mean(pred_nn_mat @ nn_label, axis=1, keepdims=True)
    logits = 100.0 * jnp.concatenate([pred, pred_nn], axis=1)
    logp = jax.nn.log_softmax(logits, axis=1)
    return -jnp.mean(logp[:, 0])


if __name__ == "__main__":
    key = jax.random.PRNGKey(0)
    # (batch, feat_dim, num_classes): a tiny single-tile case and a multi-tile,
    # padded-batch case (Bpad=384 -> 3 tiles of 128) to exercise the grid path.
    cases = [(16, 32, 8), (300, 64, 40)]
    for (B, D, C) in cases:
        key, kf, kq, kt = jax.random.split(key, 4)
        feature = jax.random.normal(kf, (B, D), dtype=jnp.float32)
        query = jax.random.normal(kq, (C, D), dtype=jnp.float32)
        target = jax.random.randint(kt, (B,), 0, C, dtype=jnp.int32)

        loss = jax.block_until_ready(div_loss(feature, query, target))
        ref = jax.block_until_ready(div_loss_ref(feature, query, target))

        assert jnp.isfinite(loss), (B, loss)
        assert jnp.allclose(loss, ref, rtol=5e-3, atol=5e-3), (B, loss, ref)
    print("KERNEL_OK")
</pallas_src>

<mosaic_0001>
module attributes {stable_mosaic.version = 11 : i64} {
  func.func @_divloss_kernel(%arg0: i32, %arg1: i32, %arg2: memref<8x32xf32, #tpu.memory_space<vmem>>, %arg3: memref<32x128xf32, #tpu.memory_space<vmem>>, %arg4: memref<1x128xi32, #tpu.memory_space<vmem>>, %arg5: memref<1x128xi32, #tpu.memory_space<vmem>>, %arg6: memref<1x1xf32, #tpu.memory_space<vmem>>, %arg7: memref<8x32xf32, #tpu.memory_space<vmem>>, %arg8: memref<1x128xf32, #tpu.memory_space<vmem>>, %arg9: memref<8x1xf32, #tpu.memory_space<vmem>>, %arg10: memref<1x1xf32, #tpu.memory_space<vmem>>) attributes {dimension_semantics = [#tpu.dimension_semantics<arbitrary>, #tpu.dimension_semantics<arbitrary>], iteration_bounds = array<i64: 2, 1>, scalar_prefetch = 0 : i64, scratch_operands = 4 : i64, tpu.core_type = #tpu.core_type<tc>, window_params = [{pipeline_mode = #tpu.pipeline_mode<synchronous>, transform_indices = @transform_0, window_bounds = array<i64: 8, 32>}, {transform_indices = @transform_1, window_bounds = array<i64: 32, 128>}, {transform_indices = @transform_2, window_bounds = array<i64: 1, 128>}, {transform_indices = @transform_3, window_bounds = array<i64: 1, 128>}, {pipeline_mode = #tpu.pipeline_mode<synchronous>, transform_indices = @transform_4, window_bounds = array<i64: 1, 1>}]} {
    %c0_i32 = arith.constant 0 : i32
    %0 = arith.cmpi eq, %arg0, %c0_i32 : i32
    %c0_i32_0 = arith.constant 0 : i32
    %1 = arith.cmpi eq, %arg1, %c0_i32_0 : i32
    %2 = arith.andi %0, %1 : i1
    %3 = arith.extui %2 : i1 to i32
    %c0_i32_1 = arith.constant 0 : i32
    %4 = arith.cmpi ne, %3, %c0_i32_1 : i32
    scf.if %4 {
      %c0 = arith.constant 0 : index
      %c0_5 = arith.constant 0 : index
      %13 = vector.load %arg2[%c0, %c0_5] : memref<8x32xf32, #tpu.memory_space<vmem>>, vector<8x32xf32>
      %14 = arith.mulf %13, %13 : vector<8x32xf32>
      %cst = arith.constant dense<0.000000e+00> : vector<8xf32>
      %15 = vector.multi_reduction <add>, %14, %cst [1] : vector<8x32xf32> to vector<8xf32>
      %16 = vector.shape_cast %15 : vector<8xf32> to vector<8x1xf32>
      %cst_6 = arith.constant 1.000000e-24 : f32
      %17 = vector.broadcast %cst_6 : f32 to vector<8x1xf32>
      %18 = arith.maximumf %16, %17 : vector<8x1xf32>
      %19 = math.rsqrt %18 : vector<8x1xf32>
      %20 = vector.broadcast %19 : vector<8x1xf32> to vector<8x32xf32>
      %21 = arith.mulf %13, %20 : vector<8x32xf32>
      %c0_7 = arith.constant 0 : index
      %c0_8 = arith.constant 0 : index
      %22 = vector.load %arg7[%c0_7, %c0_8] : memref<8x32xf32, #tpu.memory_space<vmem>>, vector<8x32xf32>
      tpu.vector_store %arg7[%c0_7, %c0_8], %21 {strides = array<i32>} : memref<8x32xf32, #tpu.memory_space<vmem>>, vector<8x32xf32>,
      %cst_9 = arith.constant 0.000000e+00 : f32
      %23 = vector.broadcast %cst_9 : f32 to vector<8x1xf32>
      %c0_10 = arith.constant 0 : index
      %c0_11 = arith.constant 0 : index
      %24 = vector.load %arg9[%c0_10, %c0_11] : memref<8x1xf32, #tpu.memory_space<vmem>>, vector<8x1xf32>
      tpu.vector_store %arg9[%c0_10, %c0_11], %23 {strides = array<i32>} : memref<8x1xf32, #tpu.memory_space<vmem>>, vector<8x1xf32>,
      %cst_12 = arith.constant 0.000000e+00 : f32
      %25 = vector.broadcast %cst_12 : f32 to vector<1x1xf32>
      %c0_13 = arith.constant 0 : index
      %c0_14 = arith.constant 0 : index
      %26 = vector.load %arg10[%c0_13, %c0_14] : memref<1x1xf32, #tpu.memory_space<vmem>>, vector<1x1xf32>
      tpu.vector_store %arg10[%c0_13, %c0_14], %25 {strides = array<i32>} : memref<1x1xf32, #tpu.memory_space<vmem>>, vector<1x1xf32>,
    } else {
    }
    %c128_i32 = arith.constant 128 : i32
    %5 = arith.muli %arg1, %c128_i32 : i32
    %6 = tpu.assume_multiple %5, 128 : i32
    %c0_i32_2 = arith.constant 0 : i32
    %7 = arith.cmpi eq, %arg0, %c0_i32_2 : i32
    %8 = arith.extui %7 : i1 to i32
    %c0_i32_3 = arith.constant 0 : i32
    %9 = arith.cmpi ne, %8, %c0_i32_3 : i32
    scf.if %9 {
      %c0 = arith.constant 0 : index
      %c0_5 = arith.constant 0 : index
      %13 = vector.load %arg3[%c0, %c0_5] : memref<32x128xf32, #tpu.memory_space<vmem>>, vector<32x128xf32>
      %14 = arith.mulf %13, %13 : vector<32x128xf32>
      %cst = arith.constant dense<0.000000e+00> : vector<128xf32>
      %15 = vector.multi_reduction <add>, %14, %cst [0] : vector<32x128xf32> to vector<128xf32>
      %16 = vector.shape_cast %15 : vector<128xf32> to vector<1x128xf32>
      %cst_6 = arith.constant 1.000000e-24 : f32
      %17 = vector.broadcast %cst_6 : f32 to vector<1x128xf32>
      %18 = arith.maximumf %16, %17 : vector<1x128xf32>
      %19 = math.rsqrt %18 : vector<1x128xf32>
      %20 = vector.broadcast %19 : vector<1x128xf32> to vector<32x128xf32>
      %21 = arith.mulf %13, %20 : vector<32x128xf32>
      %c0_7 = arith.constant 0 : index
      %c0_8 = arith.constant 0 : index
      %22 = vector.load %arg7[%c0_7, %c0_8] : memref<8x32xf32, #tpu.memory_space<vmem>>, vector<8x32xf32>
      %cst_9 = arith.constant dense<0.000000e+00> : vector<8x128xf32>
      %23 = tpu.matmul %22, %21, %cst_9 {dimension_numbers = #tpu.dot_dimension_numbers<[1], [0], [0], [1], [0, 0, 1, 1], [], []>} : vector<8x32xf32>, vector<32x128xf32>, vector<8x128xf32> -> vector<8x128xf32>
      %24 = tpu.iota {dimensions = array<i32: 0>} : vector<8x128xi32>
      %c0_10 = arith.constant 0 : index
      %c0_11 = arith.constant 0 : index
      %25 = vector.load %arg4[%c0_10, %c0_11] : memref<1x128xi32, #tpu.memory_space<vmem>>, vector<1x128xi32>
      %26 = vector.broadcast %25 : vector<1x128xi32> to vector<8x128xi32>
      %27 = arith.cmpi eq, %24, %26 : vector<8x128xi32>
      %cst_12 = arith.constant 0.000000e+00 : f32
      %28 = vector.broadcast %cst_12 : f32 to vector<8x128xf32>
      %29 = arith.select %27, %23, %28 : vector<8x128xi1>, vector<8x128xf32>
      %cst_13 = arith.constant dense<0.000000e+00> : vector<128xf32>
      %30 = vector.multi_reduction <add>, %29, %cst_13 [0] : vector<8x128xf32> to vector<128xf32>
      %31 = vector.shape_cast %30 : vector<128xf32> to vector<1x128xf32>
      %c0_14 = arith.constant 0 : index
      %32 = arith.index_cast %6 : i32 to index
      %33 = vector.load %arg8[%c0_14, %32] : memref<1x128xf32, #tpu.memory_space<vmem>>, vector<1x128xf32>
      tpu.vector_store %arg8[%c0_14, %32], %31 {strides = array<i32>} : memref<1x128xf32, #tpu.memory_space<vmem>>, vector<1x128xf32>,
      %c0_15 = arith.constant 0 : index
      %c0_16 = arith.constant 0 : index
      %34 = vector.load %arg9[%c0_15, %c0_16] : memref<8x1xf32, #tpu.memory_space<vmem>>, vector<8x1xf32>
      %cst_17 = arith.constant dense<0.000000e+00> : vector<8xf32>
      %35 = vector.multi_reduction <add>, %23, %cst_17 [1] : vector<8x128xf32> to vector<8xf32>
      %36 = vector.shape_cast %35 : vector<8xf32> to vector<8x1xf32>
      %37 = arith.addf %34, %36 : vector<8x1xf32>
      %c0_18 = arith.constant 0 : index
      %c0_19 = arith.constant 0 : index
      %38 = vector.load %arg9[%c0_18, %c0_19] : memref<8x1xf32, #tpu.memory_space<vmem>>, vector<8x1xf32>
      tpu.vector_store %arg9[%c0_18, %c0_19], %37 {strides = array<i32>} : memref<8x1xf32, #tpu.memory_space<vmem>>, vector<8x1xf32>,
    } else {
    }
    %c1_i32 = arith.constant 1 : i32
    %10 = arith.cmpi eq, %arg0, %c1_i32 : i32
    %11 = arith.extui %10 : i1 to i32
    %c0_i32_4 = arith.constant 0 : i32
    %12 = arith.cmpi ne, %11, %c0_i32_4 : i32
    scf.if %12 {
      %13 = tpu.iota {dimensions = array<i32: 0>} : vector<8x128xi32>
      %c0 = arith.constant 0 : index
      %c0_5 = arith.constant 0 : index
      %14 = vector.load %arg9[%c0, %c0_5] : memref<8x1xf32, #tpu.memory_space<vmem>>, vector<8x1xf32>
      %15 = vector.shape_cast %14 : vector<8x1xf32> to vector<8x1xf32>
      %16 = vector.broadcast %15 : vector<8x1xf32> to vector<8x128xf32>
      %c0_6 = arith.constant 0 : index
      %c0_7 = arith.constant 0 : index
      %17 = vector.load %arg5[%c0_6, %c0_7] : memref<1x128xi32, #tpu.memory_space<vmem>>, vector<1x128xi32>
      %18 = vector.broadcast %17 : vector<1x128xi32> to vector<8x128xi32>
      %19 = arith.cmpi eq, %13, %18 : vector<8x128xi32>
      %cst = arith.constant 0.000000e+00 : f32
      %20 = vector.broadcast %cst : f32 to vector<8x128xf32>
      %21 = arith.select %19, %16, %20 : vector<8x128xi1>, vector<8x128xf32>
      %cst_8 = arith.constant dense<0.000000e+00> : vector<128xf32>
      %22 = vector.multi_reduction <add>, %21, %cst_8 [0] : vector<8x128xf32> to vector<128xf32>
      %23 = vector.shape_cast %22 : vector<128xf32> to vector<1x128xf32>
      %cst_9 = arith.constant 6.250000e-01 : f32
      %24 = vector.broadcast %cst_9 : f32 to vector<1x128xf32>
      %25 = arith.mulf %24, %23 : vector<1x128xf32>
      %c0_10 = arith.constant 0 : index
      %26 = arith.index_cast %6 : i32 to index
      %27 = vector.load %arg8[%c0_10, %26] : memref<1x128xf32, #tpu.memory_space<vmem>>, vector<1x128xf32>
      %cst_11 = arith.constant 1.000000e+02 : f32
      %28 = vector.broadcast %cst_11 : f32 to vector<1x128xf32>
      %29 = arith.mulf %28, %27 : vector<1x128xf32>
      %cst_12 = arith.constant 1.000000e+02 : f32
      %30 = vector.broadcast %cst_12 : f32 to vector<1x128xf32>
      %31 = arith.mulf %30, %25 : vector<1x128xf32>
      %32 = arith.maximumf %29, %31 : vector<1x128xf32>
      %33 = arith.subf %29, %32 : vector<1x128xf32>
      %34 = math.exp %33 : vector<1x128xf32>
      %35 = arith.subf %31, %32 : vector<1x128xf32>
      %36 = math.exp %35 : vector<1x128xf32>
      %37 = arith.addf %34, %36 : vector<1x128xf32>
      %38 = math.log %37 : vector<1x128xf32>
      %39 = arith.addf %32, %38 : vector<1x128xf32>
      %c0_13 = arith.constant 0 : index
      %c0_14 = arith.constant 0 : index
      %40 = vector.load %arg4[%c0_13, %c0_14] : memref<1x128xi32, #tpu.memory_space<vmem>>, vector<1x128xi32>
      %c0_i32_15 = arith.constant 0 : i32
      %41 = vector.broadcast %c0_i32_15 : i32 to vector<1x128xi32>
      %42 = arith.cmpi sge, %40, %41 : vector<1x128xi32>
      %c0_16 = arith.constant 0 : index
      %c0_17 = arith.constant 0 : index
      %43 = vector.load %arg10[%c0_16, %c0_17] : memref<1x1xf32, #tpu.memory_space<vmem>>, vector<1x1xf32>
      %44 = arith.subf %39, %29 : vector<1x128xf32>
      %cst_18 = arith.constant 0.000000e+00 : f32
      %45 = vector.broadcast %cst_18 : f32 to vector<1x128xf32>
      %46 = arith.select %42, %44, %45 : vector<1x128xi1>, vector<1x128xf32>
      %cst_19 = arith.constant dense<0.000000e+00> : vector<1xf32>
      %47 = vector.multi_reduction <add>, %46, %cst_19 [1] : vector<1x128xf32> to vector<1xf32>
      %48 = vector.shape_cast %47 : vector<1xf32> to vector<1x1xf32>
      %49 = arith.addf %43, %48 : vector<1x1xf32>
      %c0_20 = arith.constant 0 : index
      %c0_21 = arith.constant 0 : index
      %50 = vector.load %arg10[%c0_20, %c0_21] : memref<1x1xf32, #tpu.memory_space<vmem>>, vector<1x1xf32>
      tpu.vector_store %arg10[%c0_20, %c0_21], %49 {strides = array<i32>} : memref<1x1xf32, #tpu.memory_space<vmem>>, vector<1x1xf32>,
      %c0_i32_22 = arith.constant 0 : i32
      %51 = arith.cmpi eq, %arg1, %c0_i32_22 : i32
      %52 = arith.extui %51 : i1 to i32
      %c0_i32_23 = arith.constant 0 : i32
      %53 = arith.cmpi ne, %52, %c0_i32_23 : i32
      scf.if %53 {
        %c0_24 = arith.constant 0 : index
        %c0_25 = arith.constant 0 : index
        %54 = vector.load %arg10[%c0_24, %c0_25] : memref<1x1xf32, #tpu.memory_space<vmem>>, vector<1x1xf32>
        %cst_26 = arith.constant 6.250000e-02 : f32
        %55 = vector.broadcast %cst_26 : f32 to vector<1x1xf32>
        %56 = arith.mulf %54, %55 : vector<1x1xf32>
        %c0_27 = arith.constant 0 : index
        %c0_28 = arith.constant 0 : index
        %57 = vector.load %arg6[%c0_27, %c0_28] : memref<1x1xf32, #tpu.memory_space<vmem>>, vector<1x1xf32>
        tpu.vector_store %arg6[%c0_27, %c0_28], %56 {strides = array<i32>} : memref<1x1xf32, #tpu.memory_space<vmem>>, vector<1x1xf32>,
      } else {
      }
    } else {
    }
    return
  }
  func.func @transform_0(%arg0: i32, %arg1: i32) -> (i32, i32) {
    %c0_i32 = arith.constant 0 : i32
    %c0_i32_0 = arith.constant 0 : i32
    %c0_i32_1 = arith.constant 0 : i32
    return %c0_i32, %c0_i32_0 : i32, i32
  }
  func.func @transform_1(%arg0: i32, %arg1: i32) -> (i32, i32) {
    %c1_i32 = arith.constant 1 : i32
    %0 = arith.subi %c1_i32, %arg0 : i32
    %1 = arith.muli %arg1, %0 : i32
    %c0_i32 = arith.constant 0 : i32
    %2 = arith.muli %c0_i32, %arg0 : i32
    %3 = arith.addi %1, %2 : i32
    %c0_i32_0 = arith.constant 0 : i32
    %c0_i32_1 = arith.constant 0 : i32
    return %c0_i32_0, %3 : i32, i32
  }
  func.func @transform_2(%arg0: i32, %arg1: i32) -> (i32, i32) {
    %c0_i32 = arith.constant 0 : i32
    %c0_i32_0 = arith.constant 0 : i32
    return %c0_i32, %arg1 : i32, i32
  }
  func.func @transform_3(%arg0: i32, %arg1: i32) -> (i32, i32) {
    %c0_i32 = arith.constant 0 : i32
    %c0_i32_0 = arith.constant 0 : i32
    return %c0_i32, %arg1 : i32, i32
  }
  func.func @transform_4(%arg0: i32, %arg1: i32) -> (i32, i32) {
    %c0_i32 = arith.constant 0 : i32
    %c0_i32_0 = arith.constant 0 : i32
    %c0_i32_1 = arith.constant 0 : i32
    return %c0_i32, %c0_i32_0 : i32, i32
  }
}

</mosaic_0001>

<bundles_post_ra>
// kernel: div_loss.1
= control target key start
LH: loop header
LB: loop body
LE: loop exit
PB: predicated region body
PF: predicated region fallthrough
CT: control target
= control target key end

     0   :  { %9 = vsyncpa [#allocation7], 0  ;;  %s696_s15 = smov 0   ;;  %s698_s16 = smov 0   ;;  %s781_s0 = inlined_call_operand.vmem [shape: f32[8,32], index: 0, kind: input, shape index: {}]   ;;  %s782_s1 = inlined_call_operand.vmem [shape: f32[32,128], index: 1, kind: input, shape index: {}]   ;;  %s783_s2 = inlined_call_operand.vmem [shape: s32[1,128], index: 2, kind: input, shape index: {}]   ;;  %s784_s3 = inlined_call_operand.vmem [shape: s32[1,128], index: 3, kind: input, shape index: {}]   ;;  %s785_s4 = inlined_call_operand.hbm [shape: f32[1,1], index: 4, kind: output, shape index: {}]  }
   0x1   :  { %s700_s17 = smov 0  }
   0x2 LB: > { %s524_s18 = sadd.s32 4294967295, %s663_s17   ;;  %s27_s19 = sadd.s32 1, %s659_s16  ;;  %s663_s17 = sphi %s700_s17, %s15_s17   ;;  %s659_s16 = sphi %s698_s16, %s788_s16   ;;  %s655_s15 = sphi %s696_s15, %s787_s15  }
   0x3   : > { %p29_p0 = scmp.ge.s32.totalorder %s27_s19, 2  ;;  %p530_p1 = scmp.ge.s32.totalorder %s663_s17, 1 }
   0x4   : > { %p193_p2 = scmp.lt.s32.totalorder %s663_s17, 3 }
   0x5   : > { %s790_s19 = smov (%p29_p0, %s27_s19), 0 }
   0x6   : > { %p194_p3 = pnand %p530_p1, %p193_p2 }
   0x7   : > { %p235_p4 = scmp.eq.s32.totalorder (!%p194_p3), %s655_s15, 0 }
   0x8   : > { %197 = sbr.rel (%p194_p3) target bundleno = 951 (0x3b7), region = 36 }
   0xf   : > { %240 = sbr.rel (!%p235_p4) target bundleno = 177 (0xb1), region = 40  ;;  %v241_v0 = vld [vmem:[%s781_s0] sm:$0xff] (%p235_p4)  ;;  %vm243_vm0 = vcmask (%p235_p4), 261120   ;;  %vm251_vm1 = vcmask (%p235_p4), 7168   ;;  %vm253_vm2 = vcmask (%p235_p4), 0   ;;  %v665_v3 = vmov (%p235_p4), 0.0  }
  0x10   : > { %v242_v1 = vmul.f32 (%p235_p4), %v241_v0, %v241_v0  ;;  %252 = vst.msk [vmem:[#allocation4] sm:$0xff] (%p235_p4), %vm251_vm1, %v665_v3 }
  0x11   : > { %254 = vst.msk [vmem:[#allocation5] sm:$0x1] (%p235_p4), %vm253_vm2, %v665_v3 }
  0x12   : > { %v244_v2 = vsel (%p235_p4), %vm243_vm0, %v242_v1, 0.0 }
  0x13   : > { %245 = vadd.xlane.f32.xlu0 (%p235_p4), %v244_v2 }
  0xa0   : > { %v246_v4 = vpop.xlane.xlu0 %245 }
  0xa1   : > { %v247_v5 = vmax.f32 %v246_v4, 1e-24 }
  0xa3   : > { %600 = vrsqrt.f32 %v247_v5 }
  0xad   : > { %v601_v6 = vpop.eup %600 }
  0xae   : > { %v249_v7 = vmul.f32 %v601_v6, %v241_v0 }
  0xb0   : > { %250 = vst.msk [vmem:[#allocation2] sm:$0xff] %vm243_vm0, %v249_v7 }
  0xb1 PF: > { %p532_p5 = scmp.ne.s32.totalorder %s655_s15, 0 }
  0xb2   : > { %v259_v8 = vld [vmem:[%s782_s1] sm:$0xff] (!%p532_p5)  ;;  %v260_v9 = vld [vmem:[%s782_s1 + $0x8] sm:$0xff] (!%p532_p5)  ;;  %v261_v10 = vld [vmem:[%s782_s1 + $0x10] sm:$0xff] (!%p532_p5)  ;;  %v666_v11 = vmov (!%p532_p5), 0.0|0.0   ;;  %vm667_vm3 = vmmov (!%p532_p5), 0   ;;  %v668_v16 = vmov (!%p532_p5), 0.0   ;;  %v357_v36 = vlaneseq (!%p532_p5) }
  0xb3   : > { %258 = sbr.rel (%p532_p5) target bundleno = 580 (0x244), region = 44  ;;  %558 = vmatprep.subr.bf16.mxu0 (!%p532_p5), %v666_v11  ;;  %v262_v12 = vld [vmem:[%s782_s1 + $0x18] sm:$0xff] (!%p532_p5)  ;;  %v263_v13 = vmul.f32 (!%p532_p5), %v259_v8, %v259_v8  ;;  %v264_v14 = vmul.f32 (!%p532_p5), %v260_v9, %v260_v9  ;;  %v265_v15 = vmul.f32 (!%p532_p5), %v261_v10, %v261_v10  ;;  %555 = vmatprep.mubr.msk.f32.mxu0 (!%p532_p5), %vm667_vm3, %v668_v16  ;;  %vm283_vm4 = vcmask (!%p532_p5), 261120   ;;  %v534_v38 = vld [vmem:[%s783_s2] ss:$0 sm:$0xff] (!%p532_p5)  ;;  %v376_v48 = vld [vmem:[#allocation4] sm:$0xff] (!%p532_p5) }
  0xb4   : > { %v266_v17 = vmul.f32 (!%p532_p5), %v262_v12, %v262_v12  ;;  %v358_v37 = vshrl.u32 (!%p532_p5), %v357_v36, 7  ;;  %vm380_vm6 = vcmask (!%p532_p5), 7168  }
  0xb5   : > { %v267_v18 = vadd.f32 (!%p532_p5), %v264_v14, %v263_v13 }
  0xb6   : > { %vm364_vm5 = vcmp.eq.s32.totalorder (!%p532_p5), %v358_v37, %v534_v38 }
  0xb7   : > { %v268_v19 = vadd.f32 (!%p532_p5), %v267_v18, %v265_v15  ;;  %v282_v35 = vld [vmem:[#allocation2] sm:$0xff] (!%p532_p5) }
  0xb9   : > { %v269_v20 = vadd.f32 (!%p532_p5), %v268_v19, %v266_v17 }
  0xbb   : > { %v270_v21 = vrot.slane %v269_v20, 4 }
  0xbd   : > { %v271_v22 = vadd.f32 %v270_v21, %v269_v20 }
  0xbf   : > { %v272_v23 = vrot.slane %v271_v22, 2 }
  0xc1   : > { %v273_v24 = vadd.f32 %v272_v23, %v271_v22 }
  0xc3   : > { %v274_v25 = vrot.slane %v273_v24, 1 }
  0xc5   : > { %v275_v26 = vadd.f32 %v274_v25, %v273_v24 }
  0xc7   : > { %v276_v27 = vmax.f32 %v275_v26, 1e-24 }
  0xc9   : > { %602 = vrsqrt.f32 %v276_v27 }
  0xd3   : > { %v603_v28 = vpop.eup %602 }
  0xd4   : > { %v278_v29 = vmul.f32 %v603_v28, %v259_v8  ;;  %v279_v30 = vmul.f32 %v603_v28, %v260_v9  ;;  %v280_v31 = vmul.f32 %v603_v28, %v261_v10  ;;  %v281_v32 = vmul.f32 %v603_v28, %v262_v12 }
  0xd6   : > { %v559_v33 = vpack.c.bf16 %v279_v30, %v278_v29  ;;  %v562_v34 = vpack.c.bf16 %v281_v32, %v280_v31 }
  0xd8   : > { %560 = vmatpush3.bf16.msra.mxu0 %v559_v33 }
  0xd9   : > { %561 = vmatprep.subr.bf16.mxu0 %v666_v11 }
  0xdc   : > { %563 = vmatpush3.bf16.msra.mxu0 %v562_v34 }
  0xdf   : > { %556 = vmatmul.mubr.msk.f32.vlgmr.msra.gmra.mrb[0].mxu0 %vm283_vm4, %v282_v35 }
 0x1b2   : > { %v353_v39 = vpop.f32.mrb[0].mxu0 }
 0x1b3   : > { %v365_v40 = vsel %vm364_vm5, %v353_v39, 0.0  ;;  %v557_v41 = vpop.f32.mrb[1].mxu0  ;;  %377 = vadd.xlane.f32.xlu0 %v353_v39 }
 0x1b4   : > { %v366_v42 = vrot.slane %v365_v40, 4 }
 0x1b6   : > { %v367_v43 = vadd.f32 %v366_v42, %v365_v40 }
 0x1b8   : > { %v368_v44 = vrot.slane %v367_v43, 2 }
 0x1ba   : > { %v369_v45 = vadd.f32 %v368_v44, %v367_v43 }
 0x1bc   : > { %v370_v46 = vrot.slane %v369_v45, 1 }
 0x1be   : > { %v371_v47 = vadd.f32 %v370_v46, %v369_v45 }
 0x1c0   : > { %375 = vst [vmem:[#allocation3] sm:$0x1] %v371_v47 }
 0x240   : > { %v378_v49 = vpop.xlane.xlu0 %377 }
 0x241   : > { %v379_v50 = vadd.f32 %v378_v49, %v376_v48 }
 0x243   : > { %381 = vst.msk [vmem:[#allocation4] sm:$0xff] %vm380_vm6, %v379_v50 }
 0x244 PF: > { %p535_p6 = scmp.ne.s32.totalorder %s655_s15, 1 }
 0x245   : > { %v669_v52 = vmov (!%p535_p6), 0   ;;  %v386_v53 = vlaneseq (!%p535_p6)  ;;  %v536_v55 = vld [vmem:[%s784_s3] ss:$0 sm:$0xff] (!%p535_p6)  ;;  %v411_v63 = vld [vmem:[#allocation3] sm:$0x1] (!%p535_p6)  ;;  %vm430_vm9 = vcmask (!%p535_p6), 1040384  }
 0x246   : > { %385 = sbr.rel (%p535_p6) target bundleno = 926 (0x39e), region = 48  ;;  %604 = vset.pattern.permute.xlu0 (!%p535_p6), %v669_v52  ;;  %v412_v2 = vmul.f32 (!%p535_p6), 100.0, %v411_v63  ;;  %v425_v14 = vld [vmem:[%s783_s2] sm:$0x1] (!%p535_p6)  ;;  %v427_v19 = vld [vmem:[#allocation5] sm:$0x1] (!%p535_p6) }
 0x247   : > { %v387_v54 = vshrl.u32 (!%p535_p6), %v386_v53, 7  ;;  %vm426_vm8 = vcmp.ge.s32.totalorder (!%p535_p6), %v425_v14, 0  ;;  %vm435_vm10 = vcmask (!%p535_p6), 0  }
 0x249   : > { %vm399_vm7 = vcmp.eq.s32.totalorder (!%p535_p6), %v387_v54, %v536_v55 }
 0x24a   : > { %v388_v51 = vld [vmem:[#allocation4] sm:$0xff] (!%p535_p6) }
 0x24b   : > { %391 = vperm.xlu0 (!%p535_p6), %604, %v388_v51  }
 0x2ca   : > { %v392_v56 = vpop.permute.xlu0 %391 }
 0x2cb   : > { %v400_v57 = vsel %vm399_vm7, %v392_v56, 0.0 }
 0x2cc   : > { %v401_v58 = vrot.slane %v400_v57, 4 }
 0x2ce   : > { %v402_v59 = vadd.f32 %v401_v58, %v400_v57 }
 0x2d0   : > { %v403_v60 = vrot.slane %v402_v59, 2 }
 0x2d2   : > { %v404_v61 = vadd.f32 %v403_v60, %v402_v59 }
 0x2d4   : > { %v405_v62 = vrot.slane %v404_v61, 1 }
 0x2d6   : > { %v406_v0 = vadd.f32 %v405_v62, %v404_v61 }
 0x2d8   : > { %v407_v1 = vmul.f32 0.625, %v406_v0 }
 0x2da   : > { %v413_v3 = vmul.f32 100.0, %v407_v1 }
 0x2dc   : > { %v414_v4 = vmax.f32 %v412_v2, %v413_v3 }
 0x2de   : > { %v415_v5 = vsub.f32 %v412_v2, %v414_v4  ;;  %v418_v6 = vsub.f32 %v413_v3, %v414_v4 }
 0x2e0   : > { %v416_v7 = vmul.f32 1.442695, %v415_v5  ;;  %v419_v8 = vmul.f32 1.442695, %v418_v6 }
 0x2e2   : > { %605 = vpow2.f32 %v416_v7 }
 0x2e3   : > { %607 = vpow2.f32 %v419_v8 }
 0x2ec   : > { %v606_v9 = vpop.eup %605 }
 0x2ed   : > { %v608_v10 = vpop.eup %607 }
 0x2ee   : > { %v421_v11 = vadd.f32 %v608_v10, %v606_v9 }
 0x2f0   : > { %609 = vlog2.f32 %v421_v11 }
 0x2fa   : > { %v610_v12 = vpop.eup %609 }
 0x2fb   : > { %v423_v13 = vmul.f32 0.6931472, %v610_v12 }
 0x2fd   : > { %v424_v15 = vadd.f32 %v423_v13, %v414_v4 }
 0x2ff   : > { %v428_v16 = vsub.f32 %v424_v15, %v412_v2 }
 0x301   : > { %v429_v17 = vsel %vm426_vm8, %v428_v16, 0.0 }
 0x302   : > { %v431_v18 = vsel %vm430_vm9, %v429_v17, 0.0 }
 0x303   : > { %432 = vadd.xlane.f32.xlu0 %v431_v18 }
 0x390   : > { %v433_v20 = vpop.xlane.xlu0 %432 }
 0x391   : > { %v434_v21 = vadd.f32 %v433_v20, %v427_v19 }
 0x393   : > { %436 = vst.msk [vmem:[#allocation5] sm:$0x1] %vm435_vm10, %v434_v21 }
 0x39a   : > { %v440_v22 = vld [vmem:[#allocation5] sm:$0x1] }
 0x39b   : > { %v441_v23 = vmul.f32 0.0625, %v440_v22 }
 0x39d   : > { %442 = vst.msk [vmem:[#allocation6] sm:$0x1] %vm435_vm10, %v441_v23 }
 0x39e PF: > { %p746_p7 = scmp.eq.s32.totalorder %s524_s18, 1  ;;  %s670_s11 = smov [#allocation6]  }
 0x39f   : > { %s450_s12 = sshll.u32 %s670_s11, 4  ;;  %s451_s12 = int_to_ptr.vmem [resolvable:$true] %s450_s12 }
 0x3a0   : > { %s611_s13 = scalar_lea.vmem %s451_s12, 16  ;;  %s617_s14 = scalar_lea.vmem %s451_s12, 32 }
 0x3a1   : > { %p612_p8 = scmp.ne.s32.totalorder %s451_s12, %s611_s13  ;;  %p618_p11 = scmp.lt.s32.totalorder %s451_s12, %s451_s12 }
 0x3a2   : > { %p619_p12 = scmp.lt.s32.totalorder %s617_s14, %s611_s13 }
 0x3a3   : > { %p613_p9 = pnand %p612_p8, %p746_p7 }
 0x3a4   : > { %p620_p13 = por %p619_p12, %p618_p11 }
 0x3a5   : > { %p614_p10 = pneg %p613_p9 }
 0x3a7   : > { %p621_p0 = pnand %p620_p13, %p614_p10 }
 0x3a9   : > { %624 = shalt.err (!%p621_p0)
}
 0x3aa   : > { %s625_s20 = scalar_lea.hbm %s785_s4, 16 }
 0x3ab   : > { %p626_p1 = scmp.ne.s32.totalorder %s785_s4, %s625_s20  ;;  %p631_p4 = scmp.lt.u32.totalorder %s625_s20, %s785_s4 }
 0x3ad   : > { %p627_p2 = pnand %p626_p1, %p746_p7 }
 0x3af   : > { %p628_p3 = pneg %p627_p2 }
 0x3b1   : > { %p633_p5 = pnand %p631_p4, %p628_p3 }
 0x3b3   : > { %636 = shalt.err (!%p633_p5)
}
 0x3b4   : > { %565 = dma.vmem_to_hbm [thread:$0]  (%p746_p7), %s451_s12, 16, %s785_s4, [#allocation7]  }
 0x3b5   : > { %650 = dma.done.wait (%p746_p7), [#allocation7], 16  }
 0x3b6   : > { %652 = vsyncadd (%p746_p7), [#allocation7], 4294967280 }
 0x3b7 PF: > { %s15_s17 = sadd.s32 1, %s663_s17   ;;  %s787_s15 = smov %s659_s16 }
 0x3b8   : > { %p12_p6 = scmp.ge.s32.totalorder %s15_s17, 4   ;;  %s788_s16 = smov %s790_s19 }
 0x3ba   :  { %14 = sbr.rel (!%p12_p6) target bundleno = 2 (0x2), region = 87 }
 0x3c1   :  { %463 = vsyncpa [#allocation7], 1 }
 0x3c2   :  { %465 = vsyncpa [#allocation7 + $0x1], 1 }

</bundles_post_ra>
